<compile_context>
chip_gen: v7x
topology: tpu7x:2x2x1
jax: 0.10.0
libtpu: 0.0.40
codegen_flags: <defaults>
</compile_context>

<pallas_src>
import functools

import jax
import jax.numpy as jnp
import numpy as np
from jax.experimental import pallas as pl
from jax.experimental.pallas import tpu as pltpu

# ---- small hyper-parameters consistent with the module ----
FILTER_LENGTH = 128
HOP_LENGTH = 64
CUTOFF = FILTER_LENGTH // 2 + 1          # 65
PAD_RIGHT = 64                           # hard-coded in the PyTorch forward


def make_forward_basis(filter_length):
    """Deterministic STFT basis buffer, shape (2*cutoff, 1, filter_length)."""
    n = filter_length
    cutoff = n // 2 + 1
    t = jnp.arange(n, dtype=jnp.float32)
    k = jnp.arange(cutoff, dtype=jnp.float32)[:, None]
    ang = 2.0 * jnp.pi * k * t[None, :] / n
    window = 0.5 - 0.5 * jnp.cos(2.0 * jnp.pi * t / n)        # Hann
    real = jnp.cos(ang) * window[None, :]
    imag = -jnp.sin(ang) * window[None, :]
    basis = jnp.concatenate([real, imag], axis=0)             # (2*cutoff, K)
    return basis[:, None, :]                                  # (2*cutoff, 1, K)


def _round_up(x, m):
    return ((x + m - 1) // m) * m


def _stft_kernel(frames_ref, w_ref, out_ref, *, cutoff, n_half):
    # frames_ref : (ft, K)        bf16 -- one full 128-tap window per frame in the tile
    # w_ref      : (K, 2*n_half)  bf16 -- fused [real | imag] basis (each half lane-padded)
    # out_ref    : (cutoff, ft)   f32  -- magnitude, lane-dense along the frame axis
    #
    # Single K=128 MXU matmul per tile; f32 accumulation.
    acc = jnp.dot(frames_ref[...], w_ref[...], preferred_element_type=jnp.float32)
    re = acc[:, :n_half]                           # lane-aligned (n_half is a multiple of 128)
    im = acc[:, n_half:]
    mag2 = re * re + im * im                       # (ft, n_half) f32
    # Transpose first (XLU), slice to the real 65 bins, THEN sqrt -> ~45% fewer EUP pushes.
    # On the last (partial) frame tile the trailing rows hold unspecified data; sqrt of that is
    # harmless (no fp traps on TPU) and Pallas's masked output write discards those columns.
    out_ref[...] = jnp.sqrt(jnp.transpose(mag2)[:cutoff, :]).astype(out_ref.dtype)


def silero_vad_stft(input_data, forward_basis_buffer, hop_length, filter_length,
                    *, frame_tile=2048, matmul_dtype=jnp.bfloat16, out_dtype=jnp.float32):
    """JAX/Pallas equivalent of SileroVadSTFT.forward -> magnitude (B, cutoff, L)."""
    assert filter_length == 2 * hop_length, "frame decomposition assumes filter_length == 2*hop"
    assert frame_tile % 128 == 0
    cutoff = filter_length // 2 + 1
    n_half = _round_up(cutoff, 128)                # pad each of re/im to a 128-lane boundary

    # glue: reflect pad (matches F.pad(input, [0, 64], mode='reflect')).
    padded = jnp.pad(input_data.astype(jnp.float32),
                     ((0, 0), (0, PAD_RIGHT)), mode='reflect')
    B, Tp = padded.shape
    L = (Tp - filter_length) // hop_length + 1
    n_blocks = L + 1                               # hop blocks touched by the L frames

    # glue: one bf16 frames array (B, L, filter_length); frame l = [hop block l, hop block l+1].
    # Cast once, then slice+concat (fuses into a single HBM pass under XLA).
    blocks = padded[:, :n_blocks * hop_length].astype(matmul_dtype).reshape(
        B, n_blocks, hop_length)
    frames = jnp.concatenate([blocks[:, :-1, :], blocks[:, 1:, :]], axis=-1)   # (B, L, K)
    # TODO(synk): frames duplicates ~2x the signal bytes (50% frame overlap); a manual-DMA
    # kernel could stream the hop-block array once and form the +1-block shift in VMEM (v5e win).

    # glue: fused [real | imag] matmul weight, each half zero-padded to n_half lanes.
    w = forward_basis_buffer[:, 0, :].astype(jnp.float32)                # (2*cutoff, K)
    wr = jnp.pad(w[:cutoff, :].T, ((0, 0), (0, n_half - cutoff)))        # (K, n_half)
    wi = jnp.pad(w[cutoff:, :].T, ((0, 0), (0, n_half - cutoff)))        # (K, n_half)
    wf = jnp.concatenate([wr, wi], axis=1).astype(matmul_dtype)          # (K, 2*n_half)

    # Frame-tile size: full extent for tiny clips, otherwise a multiple of 128 so input/output
    # blocks stay layout-legal and stores stay lane-dense.  For B == 1 keep >= 2 grid steps so
    # both v7x TensorCores get work (no-op on single-TC v5e/v6e).
    if L <= 128:
        ft = L                                     # single full-extent block (masked-store path)
    else:
        ft = min(frame_tile, _round_up(L, 128))
        if B == 1:
            ft = min(ft, _round_up(pl.cdiv(L, 2), 128))
    grid = (B, pl.cdiv(L, ft))

    cp_kwargs = dict(dimension_semantics=("parallel", "parallel"))
    if ft >= 4096:
        # f32 acc/mag temporaries + double-buffered I/O approach v5e's 16 MiB scoped default.
        cp_kwargs["vmem_limit_bytes"] = 48 << 20

    kernel = functools.partial(_stft_kernel, cutoff=cutoff, n_half=n_half)
    mag = pl.pallas_call(
        kernel,
        out_shape=jax.ShapeDtypeStruct((B, cutoff, L), out_dtype),
        grid=grid,
        in_specs=[
            pl.BlockSpec((None, ft, filter_length), lambda b, t: (b, t, 0)),
            # Basis never changes across the grid -> constant index_map keeps it VMEM-resident.
            # TODO(synk): pipeline_mode=pl.Buffered(1) would drop the redundant second buffer
            # (~64 KiB); omitted to stay conservative across jax versions.
            pl.BlockSpec((filter_length, 2 * n_half), lambda b, t: (0, 0)),
        ],
        out_specs=pl.BlockSpec((None, cutoff, ft), lambda b, t: (b, 0, t)),
        compiler_params=pltpu.CompilerParams(**cp_kwargs),
    )(frames, wf)
    return mag
    # TODO(synk): the PyTorch forward also computes `phase = atan2(imag, real)` but discards it
    # (only magnitude is returned), so it is not emitted here.


def _reference(input_data, forward_basis_buffer, hop_length, filter_length):
    """Plain-JAX reference mirroring torch.conv1d on NCW input."""
    padded = jnp.pad(input_data.astype(jnp.float32),
                     ((0, 0), (0, PAD_RIGHT)), mode='reflect')
    out = jax.lax.conv_general_dilated(
        padded[:, None, :], forward_basis_buffer, window_strides=(hop_length,),
        padding='VALID', dimension_numbers=('NCH', 'OIH', 'NCH'))
    cutoff = filter_length // 2 + 1
    re = out[:, :cutoff, :]
    im = out[:, cutoff:, :]
    return jnp.sqrt(re * re + im * im)


if __name__ == "__main__":
    key = jax.random.PRNGKey(0)
    B, T = 2, 8192                                  # 0.5 s of 16 kHz audio -> L = 128 frames
    x = jax.random.normal(key, (B, T), dtype=jnp.float32)
    basis = make_forward_basis(FILTER_LENGTH)       # (2*cutoff, 1, K)

    mag = silero_vad_stft(x, basis, HOP_LENGTH, FILTER_LENGTH)
    mag = jax.block_until_ready(mag)

    ref = jax.block_until_ready(_reference(x, basis, HOP_LENGTH, FILTER_LENGTH))
    L = (T + PAD_RIGHT - FILTER_LENGTH) // HOP_LENGTH + 1
    assert mag.shape == ref.shape == (B, CUTOFF, L)
    # Tolerance accounts for bf16 rounding of the matmul operands (accumulation is f32); pass
    # matmul_dtype=jnp.float32 for bit-closer results to PyTorch's f32 conv1d.
    np.testing.assert_allclose(np.asarray(mag), np.asarray(ref), rtol=3e-2, atol=5e-2)

    print("KERNEL_OK")
</pallas_src>

<mosaic_0001>
module attributes {stable_mosaic.version = 11 : i64} {
  func.func @_stft_kernel(%arg0: i32, %arg1: i32, %arg2: memref<1x128x128xbf16, #tpu.memory_space<vmem>>, %arg3: memref<128x256xbf16, #tpu.memory_space<vmem>>, %arg4: memref<1x65x128xf32, #tpu.memory_space<vmem>>) attributes {dimension_semantics = [#tpu.dimension_semantics<parallel>, #tpu.dimension_semantics<parallel>], iteration_bounds = array<i64: 2, 1>, scalar_prefetch = 0 : i64, scratch_operands = 0 : i64, tpu.core_type = #tpu.core_type<tc>, window_params = [{transform_indices = @transform_0, window_bounds = array<i64: 1, 128, 128>}, {pipeline_mode = #tpu.pipeline_mode<synchronous>, transform_indices = @transform_1, window_bounds = array<i64: 128, 256>}, {transform_indices = @transform_2, window_bounds = array<i64: 1, 65, 128>}]} {
    %c0 = arith.constant 0 : index
    %c0_0 = arith.constant 0 : index
    %c0_1 = arith.constant 0 : index
    %0 = vector.load %arg2[%c0, %c0_0, %c0_1] : memref<1x128x128xbf16, #tpu.memory_space<vmem>>, vector<1x128x128xbf16>
    %1 = vector.shape_cast %0 : vector<1x128x128xbf16> to vector<128x128xbf16>
    %c0_2 = arith.constant 0 : index
    %c0_3 = arith.constant 0 : index
    %2 = vector.load %arg3[%c0_2, %c0_3] : memref<128x256xbf16, #tpu.memory_space<vmem>>, vector<128x256xbf16>
    %cst = arith.constant dense<0.000000e+00> : vector<128x256xf32>
    %3 = tpu.matmul %1, %2, %cst {dimension_numbers = #tpu.dot_dimension_numbers<[1], [0], [0], [1], [0, 0, 1, 1], [], []>} : vector<128x128xbf16>, vector<128x256xbf16>, vector<128x256xf32> -> vector<128x256xf32>
    %4 = vector.extract_strided_slice %3 {offsets = [0, 0], sizes = [128, 128], strides = [1, 1]} : vector<128x256xf32> to vector<128x128xf32>
    %5 = vector.extract_strided_slice %3 {offsets = [0, 128], sizes = [128, 128], strides = [1, 1]} : vector<128x256xf32> to vector<128x128xf32>
    %6 = arith.mulf %4, %4 : vector<128x128xf32>
    %7 = arith.mulf %5, %5 : vector<128x128xf32>
    %8 = arith.addf %6, %7 : vector<128x128xf32>
    %9 = tpu.transpose %8, [1, 0] : vector<128x128xf32> -> vector<128x128xf32>
    %10 = vector.extract_strided_slice %9 {offsets = [0, 0], sizes = [65, 128], strides = [1, 1]} : vector<128x128xf32> to vector<65x128xf32>
    %11 = math.sqrt %10 : vector<65x128xf32>
    %c0_4 = arith.constant 0 : index
    %c0_5 = arith.constant 0 : index
    %c0_6 = arith.constant 0 : index
    %12 = vector.load %arg4[%c0_4, %c0_5, %c0_6] : memref<1x65x128xf32, #tpu.memory_space<vmem>>, vector<1x65x128xf32>
    %13 = vector.shape_cast %12 : vector<1x65x128xf32> to vector<65x128xf32>
    %14 = vector.shape_cast %11 : vector<65x128xf32> to vector<1x65x128xf32>
    tpu.vector_store %arg4[%c0_4, %c0_5, %c0_6], %14 {strides = array<i32>} : memref<1x65x128xf32, #tpu.memory_space<vmem>>, vector<1x65x128xf32>,
    return
  }
  func.func @transform_0(%arg0: i32, %arg1: i32) -> (i32, i32, i32) {
    %c0_i32 = arith.constant 0 : i32
    %c0_i32_0 = arith.constant 0 : i32
    return %arg0, %arg1, %c0_i32 : i32, i32, i32
  }
  func.func @transform_1(%arg0: i32, %arg1: i32) -> (i32, i32) {
    %c0_i32 = arith.constant 0 : i32
    %c0_i32_0 = arith.constant 0 : i32
    %c0_i32_1 = arith.constant 0 : i32
    return %c0_i32, %c0_i32_0 : i32, i32
  }
  func.func @transform_2(%arg0: i32, %arg1: i32) -> (i32, i32, i32) {
    %c0_i32 = arith.constant 0 : i32
    %c0_i32_0 = arith.constant 0 : i32
    return %arg0, %c0_i32, %arg1 : i32, i32, i32
  }
}

</mosaic_0001>

<bundles_post_ra>
// kernel: tpu_custom_call.1
= control target key start
LH: loop header
LB: loop body
LE: loop exit
PB: predicated region body
PF: predicated region fallthrough
CT: control target
= control target key end

     0   :  { %7 = vsyncpa [#allocation3], 0  ;;  %s1238_s0 = inlined_call_operand.hbm [shape: bf16[2,128,128], index: 0, kind: input, shape index: {}]   ;;  %s1239_s1 = inlined_call_operand.hbm [shape: bf16[128,256], index: 1, kind: input, shape index: {}]   ;;  %s1240_s2 = inlined_call_operand.vmem [shape: f32[2,65,128], index: 2, kind: output, shape index: {}]  }
   0x1   :  { %9 = vsyncpa [#allocation3 + $0x1], 0 }
   0x2   :  { %10 = vsyncpa [#allocation5], 0  ;;  %s1045_s9 = smov 0   ;;  %s1047_s10 = smov 0  }
   0x3   :  { %s1049_s11 = smov 0   ;;  %s1051_s12 = smov 0  }
   0x4   :  { %s1053_s13 = smov 0   ;;  %s1055_s14 = smov 0  }
   0x5 LB: > { %s732_s15 = sadd.s32 4294967295, %s1021_s14   ;;  %p50_p0 = scmp.ne.s32.totalorder %s1005_s10, %s1001_s9  ;;  %s1021_s14 = sphi %s1055_s14, %s16_s14   ;;  %s1017_s13 = sphi %s1053_s13, %s1257_s13   ;;  %s1013_s12 = sphi %s1051_s12, %s1256_s12   ;;  %s1009_s11 = sphi %s1049_s11, %s1255_s11   ;;  %s1005_s10 = sphi %s1047_s10, %s1254_s10   ;;  %s1001_s9 = sphi %s1045_s9, %s1253_s9  }
   0x6   : > { %p1075_p1 = scmp.eq.s32.totalorder %s732_s15, 0  ;;  %p734_p2 = scmp.ge.s32.totalorder %s1021_s14, 1 }
   0x7   : > { %p110_p3 = scmp.lt.s32.totalorder %s1021_s14, 3  ;;  %s1023_s19 = smov [#allocation4]  }
   0x8   : > { %s1245_s16 = scalar_select %p1075_p1, 1, 0 }
   0x9   : > { %p1083_p4 = por %p1075_p1, %p50_p0  ;;  %p1087_p5 = pnand %p734_p2, %p110_p3 }
   0xa   : > { %s122_s20 = sshll.u32 %s1023_s19, 4  ;;  %s28_s22 = sadd.s32 1, %s1017_s13  ;;  %s123_s20 = int_to_ptr.vmem [resolvable:$true] %s122_s20 }
   0xb   : > { %s1246_s17 = scalar_select %p1083_p4, 1, 0 }
   0xc   : > { %s1247_s18 = scalar_select %p1087_p5, 1, 0 }
   0xd   : > { %p794_p6 = pneg %p1087_p5  ;;  %s909_s25 = scalar_lea.hbm %s1239_s1, 2048 }
   0xe   : > { %p910_p8 = scmp.ne.s32.totalorder %s1239_s1, %s909_s25  ;;  %p916_p12 = scmp.lt.u32.totalorder %s909_s25, %s1239_s1 }
   0xf   : > { %p1095_p7 = pnand %p794_p6, %p1075_p1 }
  0x11   : > { %p911_p9 = pneg %p1095_p7 }
  0x13   : > { %p912_p10 = pnand %p911_p9, %p910_p8 }
  0x15   : > { %p913_p11 = pneg %p912_p10 }
  0x17   : > { %p918_p13 = pnand %p916_p12, %p913_p11 }
  0x19   : > { %921 = shalt.err (!%p918_p13)
}
  0x1a   : > { %s922_s30 = scalar_lea.vmem %s123_s20, 2048  ;;  %p930_p6 = scmp.lt.s32.totalorder %s123_s20, %s123_s20 }
  0x1b   : > { %p923_p0 = scmp.ne.s32.totalorder %s123_s20, %s922_s30  ;;  %p931_p1 = scmp.lt.s32.totalorder %s922_s30, %s922_s30 }
  0x1d   : > { %p925_p2 = pnand %p923_p0, %p911_p9  ;;  %p932_p4 = por %p931_p1, %p930_p6 }
  0x1f   : > { %p926_p3 = pneg %p925_p2 }
  0x21   : > { %p933_p5 = pnand %p932_p4, %p926_p3 }
  0x23   : > { %936 = shalt.err (!%p933_p5)
}
  0x24   : > { %s1024_s3 = smov 128   ;;  %s1025_s4 = smov 8  }
  0x25   : > { %797 = dma.hbm_to_vmem [thread:$0]  (!%p1095_p7), %s1239_s1, 2048, %s123_s20, [#allocation5], %s1024_s3, %s1024_s3, %s1025_s4  }
  0x26   : > { %p30_p1 = scmp.ge.s32.totalorder %s28_s22, 2  ;;  %s37_s7 = sadd.s32 1, %s1009_s11 }
  0x27   : > { %p44_p4 = scmp.ne.s32.totalorder %s1009_s11, %s1005_s10  ;;  %p45_p5 = scmp.eq.s32.totalorder %s1021_s14, 0 }
  0x28   : > { %s1259_s22 = smov (%p30_p1, %s28_s22), 0  ;;  %p803_p9 = scmp.lt.s32.totalorder %s1021_s14, 2 }
  0x29   : > { %p46_p8 = por %p45_p5, %p44_p4  ;;  %s32_s8 = ssub.s32 %s1017_s13, %s1259_s22 }
  0x2a   : > { %s136_s9 = sand.u32 1, %s1009_s11   ;;  %p35_p10 = scmp.eq.s32.totalorder %s32_s8, 0 }
  0x2b   : > { %s737_s15 = sshll.u32 %s136_s9, 6  ;;  %s770_s19 = sshll.u32 %s1017_s13, 10 }
  0x2c   : > { %s1128_s23 = scalar_select %p35_p10, %s1009_s11, %s37_s7  }
  0x2d   : > { %s1133_s20 = scalar_lea.hbm %s1238_s0, %s770_s19  ;;  %s140_s25 = scalar_lea.vmem [#allocation2], %s737_s15 }
  0x2e   : > { %s149_s26 = sshll.u32 %s140_s25, 4  ;;  %p1135_p7 = pnand %p803_p9, %p46_p8  ;;  %s1139_s26 = int_to_ptr.vmem [resolvable:$true] %s149_s26 }
  0x2f   : > { %s1141_s28 = scalar_lea.sflag [#allocation3], %s136_s9  ;;  %s937_s29 = scalar_lea.hbm %s1133_s20, 1024 }
  0x30   : > { %p938_p11 = scmp.ne.s32.totalorder %s1133_s20, %s937_s29  ;;  %p939_p12 = pneg %p1135_p7 }
  0x31   : > { %s942_s4 = scalar_lea.hbm %s1238_s0, 2048  ;;  %p943_p2 = scmp.lt.u32.totalorder %s1133_s20, %s1238_s0 }
  0x32   : > { %p940_p13 = pnand %p939_p12, %p938_p11  ;;  %p944_p3 = scmp.lt.u32.totalorder %s942_s4, %s937_s29 }
  0x33   : > { %p946_p1 = scmp.lt.u32.totalorder %s937_s29, %s1133_s20 }
  0x34   : > { %p941_p0 = pneg %p940_p13  ;;  %p945_p6 = por %p944_p3, %p943_p2 }
  0x36   : > { %p947_p4 = por %p946_p1, %p945_p6 }
  0x38   : > { %p948_p5 = pnand %p947_p4, %p941_p0 }
  0x3a   : > { %951 = shalt.err (!%p948_p5)
}
  0x3b   : > { %s952_s7 = scalar_lea.vmem %s1139_s26, 1024  ;;  %s1026_s8 = smov [#allocation2]  }
  0x3c   : > { %p953_p8 = scmp.ne.s32.totalorder %s1139_s26, %s952_s7  ;;  %s957_s9 = sshll.u32 %s1026_s8, 4  ;;  %s958_s9 = int_to_ptr.vmem [resolvable:$false] %s957_s9 }
  0x3d   : > { %s959_s15 = scalar_lea.vmem %s958_s9, 2048  ;;  %p960_p11 = scmp.lt.s32.totalorder %s1139_s26, %s958_s9 }
  0x3e   : > { %p955_p9 = pnand %p953_p8, %p939_p12  ;;  %p961_p13 = scmp.lt.s32.totalorder %s959_s15, %s952_s7 }
  0x40   : > { %p956_p10 = pneg %p955_p9  ;;  %p962_p2 = por %p961_p13, %p960_p11 }
  0x42   : > { %p963_p3 = pnand %p962_p2, %p956_p10 }
  0x44   : > { %966 = shalt.err (!%p963_p3)
}
  0x45   : > { %s1027_s19 = smov 64   ;;  %s1028_s21 = smov 4  }
  0x46   : > { %801 = dma.hbm_to_vmem [thread:$0]  (!%p1135_p7), %s1133_s20, 1024, %s1139_s26, %s1141_s28, %s1027_s19, %s1027_s19, %s1028_s21  }
  0x47   : > { %p1250_p12 = scmp.ne.s32.totalorder %s1247_s18, 0 }
  0x48   : > { %s163_s24 = sand.u32 (!%p1250_p12), 1, %s1005_s10   ;;  %p1251_p0 = scmp.ne.s32.totalorder (!%p1250_p12), %s1246_s17, 0 }
  0x49   : > { %161 = sbr.rel (%p1250_p12) target bundleno = 512 (0x200), region = 28  ;;  %s741_s25 = sshll.u32 (!%p1250_p12), %s163_s24, 6 }
  0x4a   : > { %s164_s29 = scalar_lea.sflag (!%p1250_p12), [#allocation3], %s163_s24  ;;  %s1172_s30 = scalar_lea.vmem (!%p1250_p12), [#allocation2], %s741_s25 }
  0x50   : > { %992 = dma.done.wait (%p1251_p0), %s164_s29, 1024  }
  0x51   : > { %994 = vsyncadd (%p1251_p0), %s164_s29, 4294966272  ;;  %p1252_p6 = scmp.ne.s32.totalorder %s1245_s16, 0 }
  0x53   : > { %996 = dma.done.wait (%p1252_p6), [#allocation5], 2048  }
  0x54   : > { %998 = vsyncadd (%p1252_p6), [#allocation5], 4294965248  ;;  %v1029_v0 = vmov 0   ;;  %v859_v1 = vld [vmem:[#allocation4 + $0x4] ss:$8 sps:$4 sm:$0xff]   ;;  %v885_v21 = vld [vmem:[%s1172_s30 + $0x10] sm:$0xff]  }
  0x55   : > { %397 = vmatprep.mubr.bf16.mxu0 %v1029_v0  ;;  %437 = vmatprep.mubr.bf16.mxu1 %v1029_v0  ;;  %v861_v2 = vld [vmem:[#allocation4] ss:$8 sps:$4 sm:$0xff]   ;;  %v862_v3 = vld [vmem:[#allocation4 + $0x14] ss:$8 sps:$4 sm:$0xff]   ;;  %v864_v4 = vld [vmem:[#allocation4 + $0x10] ss:$8 sps:$4 sm:$0xff]  }
  0x56   : > { %365 = vmatprep.subr.bf16.mxu0 %v859_v1  ;;  %771 = vmatprep.subr.bf16.mxu1 %v859_v1  ;;  %v865_v5 = vld [vmem:[#allocation4 + $0x24] ss:$8 sps:$4 sm:$0xff]   ;;  %v867_v6 = vld [vmem:[#allocation4 + $0x20] ss:$8 sps:$4 sm:$0xff]   ;;  %v868_v7 = vld [vmem:[#allocation4 + $0x34] ss:$8 sps:$4 sm:$0xff]  }
  0x57   : > { %366 = vmatpush1.bf16.msra.mxu0 %v861_v2  ;;  %779 = vmatpush1.bf16.msra.mxu1 %v861_v2  ;;  %v870_v8 = vld [vmem:[#allocation4 + $0x30] ss:$8 sps:$4 sm:$0xff]   ;;  %v871_v9 = vld [vmem:[#allocation4 + $0x44] ss:$8 sps:$4 sm:$0xff]   ;;  %v873_v10 = vld [vmem:[#allocation4 + $0x40] ss:$8 sps:$4 sm:$0xff]  }
  0x58   : > { %367 = vmatprep.subr.bf16.mxu0 %v862_v3  ;;  %772 = vmatprep.subr.bf16.mxu1 %v862_v3  ;;  %v874_v11 = vld [vmem:[#allocation4 + $0x54] ss:$8 sps:$4 sm:$0xff]   ;;  %v876_v12 = vld [vmem:[#allocation4 + $0x50] ss:$8 sps:$4 sm:$0xff]   ;;  %v877_v13 = vld [vmem:[#allocation4 + $0x64] ss:$8 sps:$4 sm:$0xff]  }
  0x59   : > { %v879_v14 = vld [vmem:[#allocation4 + $0x60] ss:$8 sps:$4 sm:$0xff]   ;;  %v880_v15 = vld [vmem:[#allocation4 + $0x74] ss:$8 sps:$4 sm:$0xff]   ;;  %v882_v16 = vld [vmem:[#allocation4 + $0x70] ss:$8 sps:$4 sm:$0xff]  }
  0x5a   : > { %v883_v17 = vld [vmem:[%s1172_s30] sm:$0xff]   ;;  %v884_v19 = vld [vmem:[%s1172_s30 + $0x8] sm:$0xff]   ;;  %v889_v22 = vld [vmem:[%s1172_s30 + $0x30] sm:$0xff]   ;;  %p196_p7 = scmp.lt.s32.totalorder %s1013_s12, 1 }
  0x5b   : > { %368 = vmatpush1.bf16.msra.mxu0 %v864_v4  ;;  %780 = vmatpush1.bf16.msra.mxu1 %v864_v4  ;;  %v887_v18 = vld [vmem:[%s1172_s30 + $0x20] sm:$0xff]   ;;  %v888_v20 = vld [vmem:[%s1172_s30 + $0x28] sm:$0xff]   ;;  %v886_v23 = vld [vmem:[%s1172_s30 + $0x18] sm:$0xff]  }
  0x5c   : > { %369 = vmatprep.subr.bf16.mxu0 %v865_v5  ;;  %773 = vmatprep.subr.bf16.mxu1 %v865_v5  ;;  %v890_v24 = vld [vmem:[%s1172_s30 + $0x38] sm:$0xff]   ;;  %s1261_s12 = smov (!%p196_p7, %s1013_s12), 1 }
  0x5d   : > { %s787_s16 = smul.u32 72, %s1261_s12 }
  0x5f   : > { %370 = vmatpush1.bf16.msra.mxu0 %v867_v6  ;;  %781 = vmatpush1.bf16.msra.mxu1 %v867_v6  ;;  %s1209_s20 = scalar_lea.vmem %s1240_s2, %s787_s16 }
  0x60   : > { %371 = vmatprep.subr.bf16.mxu0 %v868_v7  ;;  %774 = vmatprep.subr.bf16.mxu1 %v868_v7 }
  0x63   : > { %372 = vmatpush1.bf16.msra.mxu0 %v870_v8  ;;  %782 = vmatpush1.bf16.msra.mxu1 %v870_v8 }
  0x64   : > { %373 = vmatprep.subr.bf16.mxu0 %v871_v9  ;;  %775 = vmatprep.subr.bf16.mxu1 %v871_v9 }
  0x67   : > { %374 = vmatpush1.bf16.msra.mxu0 %v873_v10  ;;  %783 = vmatpush1.bf16.msra.mxu1 %v873_v10 }
  0x68   : > { %375 = vmatprep.subr.bf16.mxu0 %v874_v11  ;;  %776 = vmatprep.subr.bf16.mxu1 %v874_v11 }
  0x6b   : > { %376 = vmatpush1.bf16.msra.mxu0 %v876_v12  ;;  %784 = vmatpush1.bf16.msra.mxu1 %v876_v12 }
  0x6c   : > { %377 = vmatprep.subr.bf16.mxu0 %v877_v13  ;;  %777 = vmatprep.subr.bf16.mxu1 %v877_v13 }
  0x6f   : > { %378 = vmatpush1.bf16.msra.mxu0 %v879_v14  ;;  %785 = vmatpush1.bf16.msra.mxu1 %v879_v14 }
  0x70   : > { %379 = vmatprep.subr.bf16.mxu0 %v880_v15  ;;  %778 = vmatprep.subr.bf16.mxu1 %v880_v15 }
  0x73   : > { %380 = vmatpush1.bf16.msra.mxu0 %v882_v16  ;;  %786 = vmatpush1.bf16.msra.mxu1 %v882_v16 }
  0x76   : > { %398 = vmatmul.mubr.bf16.vlgmr.msra.gmra.mrb[0].mxu0 %v883_v17  ;;  %438 = vmatmul.mubr.bf16.vlgmr.msra.gmra.mrb[0].mxu1 %v887_v18 }
  0x77   : > { %407 = vmatprep.mubr.bf16.mxu0 %v1029_v0  ;;  %447 = vmatprep.mubr.bf16.mxu1 %v1029_v0 }
  0x7e   : > { %408 = vmatmul.mubr.bf16.gmra.mrb[4].mxu0 %v884_v19  ;;  %448 = vmatmul.mubr.bf16.gmra.mrb[4].mxu1 %v888_v20 }
  0x7f   : > { %417 = vmatprep.mubr.bf16.mxu0 %v1029_v0  ;;  %457 = vmatprep.mubr.bf16.mxu1 %v1029_v0 }
  0x86   : > { %418 = vmatmul.mubr.bf16.gmra.mrb[8].mxu0 %v885_v21  ;;  %458 = vmatmul.mubr.bf16.gmra.mrb[8].mxu1 %v889_v22 }
  0x87   : > { %427 = vmatprep.mubr.bf16.mxu0 %v1029_v0  ;;  %467 = vmatprep.mubr.bf16.mxu1 %v1029_v0 }
  0x8e   : > { %428 = vmatmul.mubr.bf16.gmra.mrb[12].mxu0 %v886_v23  ;;  %468 = vmatmul.mubr.bf16.gmra.mrb[12].mxu1 %v890_v24 }
 0x149   : > { %v399_v25 = vpop.f32.mrb[0].mxu0  ;;  %v439_v26 = vpop.f32.mrb[0].mxu1 }
 0x14a   : > { %v478_v27 = vmul.f32 %v399_v25, %v399_v25  ;;  %v401_v28 = vpop.f32.mrb[1].mxu0  ;;  %v486_v29 = vmul.f32 %v439_v26, %v439_v26  ;;  %v441_v30 = vpop.f32.mrb[1].mxu1 }
 0x14b   : > { %v494_v31 = vmul.f32 %v401_v28, %v401_v28  ;;  %v403_v32 = vpop.f32.mrb[2].mxu0  ;;  %v502_v33 = vmul.f32 %v441_v30, %v441_v30  ;;  %v443_v34 = vpop.f32.mrb[2].mxu1 }
 0x14c   : > { %v479_v35 = vmul.f32 %v403_v32, %v403_v32  ;;  %v405_v36 = vpop.f32.mrb[3].mxu0  ;;  %v487_v37 = vmul.f32 %v443_v34, %v443_v34  ;;  %v445_v38 = vpop.f32.mrb[3].mxu1 }
 0x14d   : > { %v495_v39 = vmul.f32 %v405_v36, %v405_v36  ;;  %v510_v40 = vadd.f32 %v494_v31, %v478_v27  ;;  %v503_v41 = vmul.f32 %v445_v38, %v445_v38  ;;  %v1198_v42 = vadd.f32 %v502_v33, %v486_v29 }
 0x14f   : > { %526 = vxpose.xlu0.b32.start [1/16] (narrow) %v510_v40, 72  ;;  %v511_v43 = vadd.f32 %v495_v39, %v479_v35  ;;  %v1200_v44 = vadd.f32 %v503_v41, %v487_v37 }
 0x151   : > { %v409_v45 = vpop.f32.mrb[4].mxu0  ;;  %v449_v46 = vpop.f32.mrb[4].mxu1 }
 0x152   : > { %v480_v47 = vmul.f32 %v409_v45, %v409_v45  ;;  %v411_v48 = vpop.f32.mrb[5].mxu0  ;;  %v488_v49 = vmul.f32 %v449_v46, %v449_v46  ;;  %v451_v50 = vpop.f32.mrb[5].mxu1 }
 0x153   : > { %v496_v51 = vmul.f32 %v411_v48, %v411_v48  ;;  %v413_v52 = vpop.f32.mrb[6].mxu0  ;;  %527 = vxpose.xlu0.b32.cont [2/16] (narrow) %v511_v43, 72  ;;  %v504_v53 = vmul.f32 %v451_v50, %v451_v50  ;;  %v453_v54 = vpop.f32.mrb[6].mxu1 }
 0x154   : > { %v481_v55 = vmul.f32 %v413_v52, %v413_v52  ;;  %v415_v56 = vpop.f32.mrb[7].mxu0  ;;  %v489_v57 = vmul.f32 %v453_v54, %v453_v54  ;;  %v455_v58 = vpop.f32.mrb[7].mxu1 }
 0x155   : > { %v497_v59 = vmul.f32 %v415_v56, %v415_v56  ;;  %v512_v60 = vadd.f32 %v496_v51, %v480_v47  ;;  %v505_v61 = vmul.f32 %v455_v58, %v455_v58  ;;  %v520_v62 = vadd.f32 %v504_v53, %v488_v49 }
 0x157   : > { %528 = vxpose.xlu0.b32.cont [3/16] (narrow) %v512_v60, 72  ;;  %v513_v63 = vadd.f32 %v497_v59, %v481_v55  ;;  %v521_v0 = vadd.f32 %v505_v61, %v489_v57 }
 0x159   : > { %v419_v1 = vpop.f32.mrb[8].mxu0  ;;  %v459_v2 = vpop.f32.mrb[8].mxu1 }
 0x15a   : > { %v482_v3 = vmul.f32 %v419_v1, %v419_v1  ;;  %v421_v4 = vpop.f32.mrb[9].mxu0  ;;  %v490_v5 = vmul.f32 %v459_v2, %v459_v2  ;;  %v461_v6 = vpop.f32.mrb[9].mxu1 }
 0x15b   : > { %v498_v7 = vmul.f32 %v421_v4, %v421_v4  ;;  %v423_v8 = vpop.f32.mrb[10].mxu0  ;;  %529 = vxpose.xlu0.b32.cont [4/16] (narrow) %v513_v63, 72  ;;  %v506_v9 = vmul.f32 %v461_v6, %v461_v6  ;;  %v463_v10 = vpop.f32.mrb[10].mxu1 }
 0x15c   : > { %v483_v11 = vmul.f32 %v423_v8, %v423_v8  ;;  %v425_v12 = vpop.f32.mrb[11].mxu0  ;;  %v491_v13 = vmul.f32 %v463_v10, %v463_v10  ;;  %v465_v14 = vpop.f32.mrb[11].mxu1 }
 0x15d   : > { %v499_v15 = vmul.f32 %v425_v12, %v425_v12  ;;  %v514_v16 = vadd.f32 %v498_v7, %v482_v3  ;;  %v507_v17 = vmul.f32 %v465_v14, %v465_v14  ;;  %v522_v18 = vadd.f32 %v506_v9, %v490_v5 }
 0x15f   : > { %530 = vxpose.xlu0.b32.cont [5/16] (narrow) %v514_v16, 72  ;;  %v515_v19 = vadd.f32 %v499_v15, %v483_v11  ;;  %v523_v20 = vadd.f32 %v507_v17, %v491_v13 }
 0x161   : > { %v429_v21 = vpop.f32.mrb[12].mxu0  ;;  %v469_v22 = vpop.f32.mrb[12].mxu1 }
 0x162   : > { %v484_v23 = vmul.f32 %v429_v21, %v429_v21  ;;  %v431_v24 = vpop.f32.mrb[13].mxu0  ;;  %v492_v25 = vmul.f32 %v469_v22, %v469_v22  ;;  %v471_v26 = vpop.f32.mrb[13].mxu1 }
 0x163   : > { %v500_v27 = vmul.f32 %v431_v24, %v431_v24  ;;  %v433_v28 = vpop.f32.mrb[14].mxu0  ;;  %531 = vxpose.xlu0.b32.cont [6/16] (narrow) %v515_v19, 72  ;;  %v508_v29 = vmul.f32 %v471_v26, %v471_v26  ;;  %v473_v30 = vpop.f32.mrb[14].mxu1 }
 0x164   : > { %v485_v31 = vmul.f32 %v433_v28, %v433_v28  ;;  %v435_v32 = vpop.f32.mrb[15].mxu0  ;;  %v493_v33 = vmul.f32 %v473_v30, %v473_v30  ;;  %v475_v34 = vpop.f32.mrb[15].mxu1 }
 0x165   : > { %v501_v35 = vmul.f32 %v435_v32, %v435_v32  ;;  %v516_v36 = vadd.f32 %v500_v27, %v484_v23  ;;  %v509_v37 = vmul.f32 %v475_v34, %v475_v34  ;;  %v524_v38 = vadd.f32 %v508_v29, %v492_v25 }
 0x167   : > { %532 = vxpose.xlu0.b32.cont [7/16] (narrow) %v516_v36, 72  ;;  %v517_v39 = vadd.f32 %v501_v35, %v485_v31  ;;  %v525_v40 = vadd.f32 %v509_v37, %v493_v33 }
 0x16b   : > { %533 = vxpose.xlu0.b32.cont [8/16] (narrow) %v517_v39, 72 }
 0x16f   : > { %534 = vxpose.xlu0.b32.cont [9/16] (narrow) %v1198_v42, 72 }
 0x173   : > { %535 = vxpose.xlu0.b32.cont [10/16] (narrow) %v1200_v44, 72 }
 0x177   : > { %536 = vxpose.xlu0.b32.cont [11/16] (narrow) %v520_v62, 72 }
 0x17b   : > { %537 = vxpose.xlu0.b32.cont [12/16] (narrow) %v521_v0, 72 }
 0x17f   : > { %538 = vxpose.xlu0.b32.cont [13/16] (narrow) %v522_v18, 72 }
 0x183   : > { %539 = vxpose.xlu0.b32.cont [14/16] (narrow) %v523_v20, 72 }
 0x187   : > { %540 = vxpose.xlu0.b32.cont [15/16] (narrow) %v524_v38, 72 }
 0x18b   : > { %541 = vxpose.xlu0.b32.end [16/16] (narrow) %v525_v40, 72 }
 0x1cf   : > { %v542_v41 = vpop.trf.xlu0 }
 0x1d0   : > { %891 = vrsqrt.f32 %v542_v41  ;;  %vm560_vm0 = vcmp.eq.f32.partialorder %v542_v41, inf  ;;  %v563_v44 = vand.u32 2147483648, %v542_v41  ;;  %vm562_vm1 = vcmp.eq.f32.partialorder %v542_v41, 0.0 }
 0x1d3   : > { %v543_v43 = vpop.trf.xlu0 }
 0x1d4   : > { %893 = vrsqrt.f32 %v543_v43  ;;  %vm567_vm2 = vcmp.eq.f32.partialorder %v543_v43, inf  ;;  %v570_v53 = vand.u32 2147483648, %v543_v43  ;;  %vm569_vm3 = vcmp.eq.f32.partialorder %v543_v43, 0.0 }
 0x1d7   : > { %v544_v45 = vpop.trf.xlu0 }
 0x1d8   : > { %895 = vrsqrt.f32 %v544_v45  ;;  %vm574_vm4 = vcmp.eq.f32.partialorder %v544_v45, inf  ;;  %v577_v59 = vand.u32 2147483648, %v544_v45  ;;  %vm576_vm5 = vcmp.eq.f32.partialorder %v544_v45, 0.0 }
 0x1da   : > { %v892_v46 = vpop.eup %891 }
 0x1db   : > { %v559_v47 = vmul.f32 %v892_v46, %v542_v41  ;;  %v545_v42 = vpop.trf.xlu0 }
 0x1dc   : > { %897 = vrsqrt.f32 %v545_v42  ;;  %vm581_vm6 = vcmp.eq.f32.partialorder %v545_v42, inf  ;;  %v584_v1 = vand.u32 2147483648, %v545_v42  ;;  %vm583_vm7 = vcmp.eq.f32.partialorder %v545_v42, 0.0 }
 0x1dd   : > { %v561_v48 = vsel %vm560_vm0, %v542_v41, %v559_v47 }
 0x1de   : > { %v894_v49 = vpop.eup %893  ;;  %v564_v50 = vsel %vm562_vm1, %v563_v44, %v561_v48 }
 0x1df   : > { %621 = vst [vmem:[%s1209_s20] sm:$0xff] %v564_v50  ;;  %v566_v51 = vmul.f32 %v894_v49, %v543_v43  ;;  %v546_v52 = vpop.trf.xlu0 }
 0x1e0   : > { %899 = vrsqrt.f32 %v546_v52  ;;  %vm588_vm8 = vcmp.eq.f32.partialorder %v546_v52, inf  ;;  %v591_v7 = vand.u32 2147483648, %v546_v52  ;;  %vm590_vm9 = vcmp.eq.f32.partialorder %v546_v52, 0.0 }
 0x1e1   : > { %v568_v54 = vsel %vm567_vm2, %v543_v43, %v566_v51 }
 0x1e2   : > { %v896_v55 = vpop.eup %895  ;;  %v571_v56 = vsel %vm569_vm3, %v570_v53, %v568_v54 }
 0x1e3   : > { %622 = vst [vmem:[%s1209_s20 + $0x8] sm:$0xff] %v571_v56  ;;  %v573_v57 = vmul.f32 %v896_v55, %v544_v45  ;;  %v547_v58 = vpop.trf.xlu0 }
 0x1e4   : > { %901 = vrsqrt.f32 %v547_v58  ;;  %vm595_vm10 = vcmp.eq.f32.partialorder %v547_v58, inf  ;;  %v598_v13 = vand.u32 2147483648, %v547_v58  ;;  %vm597_vm11 = vcmp.eq.f32.partialorder %v547_v58, 0.0 }
 0x1e5   : > { %v575_v60 = vsel %vm574_vm4, %v544_v45, %v573_v57 }
 0x1e6   : > { %v898_v61 = vpop.eup %897  ;;  %v578_v62 = vsel %vm576_vm5, %v577_v59, %v575_v60 }
 0x1e7   : > { %623 = vst [vmem:[%s1209_s20 + $0x10] sm:$0xff] %v578_v62  ;;  %v580_v63 = vmul.f32 %v898_v61, %v545_v42  ;;  %v548_v0 = vpop.trf.xlu0 }
 0x1e8   : > { %903 = vrsqrt.f32 %v548_v0  ;;  %vm602_vm12 = vcmp.eq.f32.partialorder %v548_v0, inf  ;;  %v605_v18 = vand.u32 2147483648, %v548_v0  ;;  %vm604_vm13 = vcmp.eq.f32.partialorder %v548_v0, 0.0 }
 0x1e9   : > { %v582_v2 = vsel %vm581_vm6, %v545_v42, %v580_v63 }
 0x1ea   : > { %v900_v3 = vpop.eup %899  ;;  %v585_v4 = vsel %vm583_vm7, %v584_v1, %v582_v2 }
 0x1eb   : > { %624 = vst [vmem:[%s1209_s20 + $0x18] sm:$0xff] %v585_v4  ;;  %v587_v5 = vmul.f32 %v900_v3, %v546_v52  ;;  %v549_v6 = vpop.trf.xlu0 }
 0x1ec   : > { %905 = vrsqrt.f32 %v549_v6  ;;  %vm609_vm14 = vcmp.eq.f32.partialorder %v549_v6, inf  ;;  %v612_v23 = vand.u32 2147483648, %v549_v6  ;;  %vm611_vm15 = vcmp.eq.f32.partialorder %v549_v6, 0.0 }
 0x1ed   : > { %v589_v8 = vsel %vm588_vm8, %v546_v52, %v587_v5 }
 0x1ee   : > { %v902_v9 = vpop.eup %901  ;;  %v592_v10 = vsel %vm590_vm9, %v591_v7, %v589_v8 }
 0x1ef   : > { %625 = vst [vmem:[%s1209_s20 + $0x20] sm:$0xff] %v592_v10  ;;  %v594_v11 = vmul.f32 %v902_v9, %v547_v58  ;;  %v550_v12 = vpop.trf.xlu0 }
 0x1f0   : > { %907 = vrsqrt.f32 %v550_v12  ;;  %vm616_vm0 = vcmp.eq.f32.partialorder %v550_v12, inf  ;;  %v619_v28 = vand.u32 2147483648, %v550_v12  ;;  %vm618_vm1 = vcmp.eq.f32.partialorder %v550_v12, 0.0 }
 0x1f1   : > { %v596_v14 = vsel %vm595_vm10, %v547_v58, %v594_v11 }
 0x1f2   : > { %v904_v15 = vpop.eup %903  ;;  %v599_v16 = vsel %vm597_vm11, %v598_v13, %v596_v14 }
 0x1f3   : > { %626 = vst [vmem:[%s1209_s20 + $0x28] sm:$0xff] %v599_v16  ;;  %v601_v17 = vmul.f32 %v904_v15, %v548_v0 }
 0x1f5   : > { %v603_v19 = vsel %vm602_vm12, %v548_v0, %v601_v17 }
 0x1f6   : > { %v906_v20 = vpop.eup %905  ;;  %v606_v21 = vsel %vm604_vm13, %v605_v18, %v603_v19 }
 0x1f7   : > { %627 = vst [vmem:[%s1209_s20 + $0x30] sm:$0xff] %v606_v21  ;;  %v608_v22 = vmul.f32 %v906_v20, %v549_v6 }
 0x1f9   : > { %v610_v24 = vsel %vm609_vm14, %v549_v6, %v608_v22 }
 0x1fa   : > { %v908_v25 = vpop.eup %907  ;;  %v613_v26 = vsel %vm611_vm15, %v612_v23, %v610_v24 }
 0x1fb   : > { %628 = vst [vmem:[%s1209_s20 + $0x38] sm:$0xff] %v613_v26  ;;  %v615_v27 = vmul.f32 %v908_v25, %v550_v12 }
 0x1fd   : > { %v617_v29 = vsel %vm616_vm0, %v550_v12, %v615_v27 }
 0x1fe   : > { %v620_v30 = vsel %vm618_vm1, %v619_v28, %v617_v29 }
 0x1ff   : > { %629 = vst [vmem:[%s1209_s20 + $0x40] sm:$0x1] %v620_v30 }
 0x200 PF: > { %s16_s14 = sadd.s32 1, %s1021_s14   ;;  %s1253_s9 = smov %s1005_s10 }
 0x201   : > { %p13_p1 = scmp.ge.s32.totalorder %s16_s14, 4   ;;  %s1254_s10 = smov %s1009_s11 }
 0x202   : > { %s1255_s11 = smov %s1128_s23  ;;  %s1256_s12 = smov %s1017_s13 }
 0x203   : > { %s1257_s13 = smov %s1259_s22  ;;  %15 = sbr.rel (!%p13_p1) target bundleno = 5 (0x5), region = 72 }
 0x20a   :  { %657 = vsyncpa [#allocation3], 1 }
 0x20b   :  { %659 = vsyncpa [#allocation3 + $0x1], 1 }
 0x20c   :  { %660 = vsyncpa [#allocation5], 1 }

</bundles_post_ra>
